<compile_context>
chip_gen: v6e
topology: v6e:2x2x1
jax: 0.10.0
libtpu: 0.0.40
codegen_flags: <defaults>
</compile_context>

<pallas_src>
import jax
import jax.numpy as jnp
import numpy as np
from jax.experimental import pallas as pl
from jax.experimental.pallas import tpu as pltpu

# ----- model hyper-parameters (small, synthetic) -----
V = 128        # vocab size (lane-dense decoder / one-hot width)
E = 32         # embedding dim (== H so every layer's input width matches)
H = 32         # hidden dim
L = 2          # number of stacked LSTM layers
B = 2          # batch size
T = 8          # sequence length processed per kernel launch
G = 4 * H      # fused gate width (i|f|g|o) == 128 -> one lane-dense tile


def lstm_seq_kernel(ids_ref,                    # SMEM (T, B) int32 (scalar prefetch)
                    emb_ref,                    # VMEM (V, E) bf16
                    w_ref,                      # VMEM (L, 2, H, G) bf16  [.,0]=W_ih^T [.,1]=W_hh^T
                    b_ref,                      # VMEM (L, 1, G) f32      (b_ih + b_hh)
                    wdec_ref,                   # VMEM (H, V) bf16
                    bdec_ref,                   # VMEM (1, V) f32
                    h0_ref, c0_ref,             # VMEM (L, B, H) f32
                    probs_ref,                  # VMEM (1, B, V) f32  (per-step block)
                    h_out_ref, c_out_ref):      # VMEM (L, B, H) f32  (resident carry)
    t = pl.program_id(0)

    # Recurrent state lives in the VMEM-resident output blocks (constant
    # index_map) -> written back to HBM only at the end of the grid.
    @pl.when(t == 0)
    def _init():
        h_out_ref[...] = h0_ref[...]
        c_out_ref[...] = c0_ref[...]

    # ---- embedding lookup: ids read from SMEM, gather as one-hot MXU matmul ----
    lane = jax.lax.broadcasted_iota(jnp.int32, (B, V), 1)
    sub = jax.lax.broadcasted_iota(jnp.int32, (B, V), 0)
    target = jnp.zeros((B, V), jnp.int32)
    for bb in range(B):                                          # B is tiny & static
        target = jnp.where(sub == bb, ids_ref[t, bb], target)
    onehot = (lane == target).astype(jnp.bfloat16)               # (B, V)
    x = jnp.dot(onehot, emb_ref[...],
                preferred_element_type=jnp.float32)              # (B, E) f32

    # ---- stacked LSTM cells: fused 4-gate (128-lane) matmuls per layer ----
    for l in range(L):
        h_prev = h_out_ref[l]                                    # (B, H) f32
        c_prev = c_out_ref[l]                                    # (B, H) f32
        gates = (jnp.dot(x.astype(jnp.bfloat16), w_ref[l, 0],
                         preferred_element_type=jnp.float32)
                 + jnp.dot(h_prev.astype(jnp.bfloat16), w_ref[l, 1],
                           preferred_element_type=jnp.float32)
                 + b_ref[l])                                     # (B, 4H) f32
        i_g = jax.nn.sigmoid(gates[:, 0 * H:1 * H])
        f_g = jax.nn.sigmoid(gates[:, 1 * H:2 * H])
        g_g = jnp.tanh(gates[:, 2 * H:3 * H])
        o_g = jax.nn.sigmoid(gates[:, 3 * H:4 * H])
        c_new = f_g * c_prev + i_g * g_g
        h_new = o_g * jnp.tanh(c_new)
        h_out_ref[l] = h_new
        c_out_ref[l] = c_new
        x = h_new                                                # feed next layer (f32)

    # ---- decoder + stable softmax -> next-character distribution ----
    logits = jnp.dot(x.astype(jnp.bfloat16), wdec_ref[...],
                     preferred_element_type=jnp.float32) + bdec_ref[...]   # (B, V)
    m = jnp.max(logits, axis=-1, keepdims=True)
    e = jnp.exp(logits - m)
    probs_ref[0] = e / jnp.sum(e, axis=-1, keepdims=True)


def lstm_forward(ids, emb, w, b, wdec, bdec, h0, c0):
    """Pallas-backed forward over a whole sequence: (ids[T,B], h0, c0) -> (probs[T,B,V], h_T, c_T)."""
    ids = ids.astype(jnp.int32)
    c2 = lambda t, ids_ref: (0, 0)
    c3 = lambda t, ids_ref: (0, 0, 0)
    c4 = lambda t, ids_ref: (0, 0, 0, 0)

    grid_spec = pltpu.PrefetchScalarGridSpec(
        num_scalar_prefetch=1,                      # ids -> SMEM
        grid=(T,),
        in_specs=[
            pl.BlockSpec((V, E), c2),               # embedding table (resident)
            pl.BlockSpec((L, 2, H, G), c4),         # fused gate weights (resident)
            pl.BlockSpec((L, 1, G), c3),            # fused gate biases
            pl.BlockSpec((H, V), c2),               # decoder weights
            pl.BlockSpec((1, V), c2),               # decoder bias
            pl.BlockSpec((L, B, H), c3),            # h0
            pl.BlockSpec((L, B, H), c3),            # c0
        ],
        out_specs=(
            pl.BlockSpec((1, B, V), lambda t, ids_ref: (t, 0, 0)),  # per-step probs
            pl.BlockSpec((L, B, H), c3),            # final hidden state (resident carry)
            pl.BlockSpec((L, B, H), c3),            # final cell state   (resident carry)
        ),
    )
    out_shapes = (
        jax.ShapeDtypeStruct((T, B, V), jnp.float32),
        jax.ShapeDtypeStruct((L, B, H), jnp.float32),
        jax.ShapeDtypeStruct((L, B, H), jnp.float32),
    )
    return pl.pallas_call(
        lstm_seq_kernel,
        out_shape=out_shapes,
        grid_spec=grid_spec,
        compiler_params=pltpu.CompilerParams(
            dimension_semantics=("arbitrary",)),    # sequential recurrence over time
    )(ids, emb, w, b, wdec, bdec, h0, c0)


def ref_forward(ids, emb, w, b, wdec, bdec, h0, c0):
    """Pure-JAX reference with identical math (bf16 matmul inputs, f32 accumulation)."""
    h, c = h0, c0
    probs_all = []
    for t in range(T):
        x = emb[ids[t]].astype(jnp.float32)                      # (B, E)
        h_list, c_list = [], []
        for l in range(L):
            gates = (jnp.dot(x.astype(jnp.bfloat16), w[l, 0],
                             preferred_element_type=jnp.float32)
                     + jnp.dot(h[l].astype(jnp.bfloat16), w[l, 1],
                               preferred_element_type=jnp.float32)
                     + b[l])
            i_g = jax.nn.sigmoid(gates[:, 0 * H:1 * H])
            f_g = jax.nn.sigmoid(gates[:, 1 * H:2 * H])
            g_g = jnp.tanh(gates[:, 2 * H:3 * H])
            o_g = jax.nn.sigmoid(gates[:, 3 * H:4 * H])
            cn = f_g * c[l] + i_g * g_g
            hn = o_g * jnp.tanh(cn)
            h_list.append(hn)
            c_list.append(cn)
            x = hn
        h = jnp.stack(h_list)
        c = jnp.stack(c_list)
        logits = jnp.dot(x.astype(jnp.bfloat16), wdec,
                         preferred_element_type=jnp.float32) + bdec
        probs_all.append(jax.nn.softmax(logits, axis=-1))
    return jnp.stack(probs_all), h, c


def init_params(key):
    """PyTorch-style uniform(-1/sqrt(H), 1/sqrt(H)) init, in pre-fused layouts.

    Gate weights are pre-transposed and gate-fused:
      w[l, 0] = W_ih_l^T (H_in, 4H), w[l, 1] = W_hh_l^T (H, 4H),
      gate order i|f|g|o along the 128-wide lane axis.
    Biases are pre-summed (b_ih + b_hh) as (L, 1, 4H).
    """
    k_emb, k_w, k_b1, k_b2, k_wd, k_bd = jax.random.split(key, 6)
    bound = 1.0 / np.sqrt(H)
    emb = jax.random.normal(k_emb, (V, E), jnp.float32)
    w = jax.random.uniform(k_w, (L, 2, H, G), jnp.float32, -bound, bound)
    bias = (jax.random.uniform(k_b1, (L, 1, G), jnp.float32, -bound, bound)
            + jax.random.uniform(k_b2, (L, 1, G), jnp.float32, -bound, bound))
    wdec = jax.random.uniform(k_wd, (H, V), jnp.float32, -bound, bound)
    bdec = jax.random.uniform(k_bd, (1, V), jnp.float32, -bound, bound)
    # bf16 MXU operands; biases stay f32 (added after f32 accumulation).
    return (emb.astype(jnp.bfloat16), w.astype(jnp.bfloat16), bias,
            wdec.astype(jnp.bfloat16), bdec)


def init_hidden(key):
    kh, kc = jax.random.split(key)
    h = jax.random.normal(kh, (L, B, H), jnp.float32)
    c = jax.random.normal(kc, (L, B, H), jnp.float32)
    return h, c


if __name__ == "__main__":
    key = jax.random.PRNGKey(0)
    k_par, k_hid, k_ids = jax.random.split(key, 3)

    params = init_params(k_par)
    h0, c0 = init_hidden(k_hid)
    ids = jax.random.randint(k_ids, (T, B), 0, V, jnp.int32)

    probs, h1, c1 = lstm_forward(ids, *params, h0, c0)
    jax.block_until_ready((probs, h1, c1))

    probs_r, h1_r, c1_r = ref_forward(ids, *params, h0, c0)
    assert np.allclose(np.asarray(probs), np.asarray(probs_r), atol=2e-3, rtol=2e-3)
    assert np.allclose(np.asarray(h1), np.asarray(h1_r), atol=2e-3, rtol=2e-3)
    assert np.allclose(np.asarray(c1), np.asarray(c1_r), atol=2e-3, rtol=2e-3)
    assert np.allclose(np.asarray(probs).sum(-1), 1.0, atol=1e-4)

    print("KERNEL_OK")
</pallas_src>

<mosaic_0001>
module attributes {stable_mosaic.version = 11 : i64} {
  func.func @lstm_seq_kernel(%arg0: i32, %arg1: memref<8x2xi32, #tpu.memory_space<smem>>, %arg2: memref<128x32xbf16, #tpu.memory_space<vmem>>, %arg3: memref<2x2x32x128xbf16, #tpu.memory_space<vmem>>, %arg4: memref<2x1x128xf32, #tpu.memory_space<vmem>>, %arg5: memref<32x128xbf16, #tpu.memory_space<vmem>>, %arg6: memref<1x128xf32, #tpu.memory_space<vmem>>, %arg7: memref<2x2x32xf32, #tpu.memory_space<vmem>>, %arg8: memref<2x2x32xf32, #tpu.memory_space<vmem>>, %arg9: memref<1x2x128xf32, #tpu.memory_space<vmem>>, %arg10: memref<2x2x32xf32, #tpu.memory_space<vmem>>, %arg11: memref<2x2x32xf32, #tpu.memory_space<vmem>>) attributes {dimension_semantics = [#tpu.dimension_semantics<arbitrary>], iteration_bounds = array<i64: 8>, scalar_prefetch = 1 : i64, scratch_operands = 0 : i64, tpu.core_type = #tpu.core_type<tc>, window_params = [{pipeline_mode = #tpu.pipeline_mode<synchronous>, transform_indices = @transform_0, window_bounds = array<i64: 128, 32>}, {pipeline_mode = #tpu.pipeline_mode<synchronous>, transform_indices = @transform_1, window_bounds = array<i64: 2, 2, 32, 128>}, {pipeline_mode = #tpu.pipeline_mode<synchronous>, transform_indices = @transform_2, window_bounds = array<i64: 2, 1, 128>}, {pipeline_mode = #tpu.pipeline_mode<synchronous>, transform_indices = @transform_3, window_bounds = array<i64: 32, 128>}, {pipeline_mode = #tpu.pipeline_mode<synchronous>, transform_indices = @transform_4, window_bounds = array<i64: 1, 128>}, {pipeline_mode = #tpu.pipeline_mode<synchronous>, transform_indices = @transform_5, window_bounds = array<i64: 2, 2, 32>}, {pipeline_mode = #tpu.pipeline_mode<synchronous>, transform_indices = @transform_6, window_bounds = array<i64: 2, 2, 32>}, {transform_indices = @transform_7, window_bounds = array<i64: 1, 2, 128>}, {pipeline_mode = #tpu.pipeline_mode<synchronous>, transform_indices = @transform_8, window_bounds = array<i64: 2, 2, 32>}, {pipeline_mode = #tpu.pipeline_mode<synchronous>, transform_indices = @transform_9, window_bounds = array<i64: 2, 2, 32>}]} {
    %c0_i32 = arith.constant 0 : i32
    %0 = arith.cmpi eq, %arg0, %c0_i32 : i32
    %1 = arith.extui %0 : i1 to i32
    %c0_i32_0 = arith.constant 0 : i32
    %2 = arith.cmpi ne, %1, %c0_i32_0 : i32
    scf.if %2 {
      %c0_71 = arith.constant 0 : index
      %c0_72 = arith.constant 0 : index
      %c0_73 = arith.constant 0 : index
      %138 = vector.load %arg7[%c0_71, %c0_72, %c0_73] : memref<2x2x32xf32, #tpu.memory_space<vmem>>, vector<2x2x32xf32>
      %c0_74 = arith.constant 0 : index
      %c0_75 = arith.constant 0 : index
      %c0_76 = arith.constant 0 : index
      %139 = vector.load %arg10[%c0_74, %c0_75, %c0_76] : memref<2x2x32xf32, #tpu.memory_space<vmem>>, vector<2x2x32xf32>
      tpu.vector_store %arg10[%c0_74, %c0_75, %c0_76], %138 {strides = array<i32>} : memref<2x2x32xf32, #tpu.memory_space<vmem>>, vector<2x2x32xf32>,
      %c0_77 = arith.constant 0 : index
      %c0_78 = arith.constant 0 : index
      %c0_79 = arith.constant 0 : index
      %140 = vector.load %arg8[%c0_77, %c0_78, %c0_79] : memref<2x2x32xf32, #tpu.memory_space<vmem>>, vector<2x2x32xf32>
      %c0_80 = arith.constant 0 : index
      %c0_81 = arith.constant 0 : index
      %c0_82 = arith.constant 0 : index
      %141 = vector.load %arg11[%c0_80, %c0_81, %c0_82] : memref<2x2x32xf32, #tpu.memory_space<vmem>>, vector<2x2x32xf32>
      tpu.vector_store %arg11[%c0_80, %c0_81, %c0_82], %140 {strides = array<i32>} : memref<2x2x32xf32, #tpu.memory_space<vmem>>, vector<2x2x32xf32>,
    } else {
    }
    %3 = tpu.iota {dimensions = array<i32: 1>} : vector<2x128xi32>
    %4 = tpu.iota {dimensions = array<i32: 0>} : vector<2x128xi32>
    %c0_i32_1 = arith.constant 0 : i32
    %5 = vector.broadcast %c0_i32_1 : i32 to vector<2x128xi32>
    %c0_i32_2 = arith.constant 0 : i32
    %6 = vector.broadcast %c0_i32_2 : i32 to vector<2x128xi32>
    %7 = arith.cmpi eq, %4, %6 : vector<2x128xi32>
    %8 = arith.index_cast %arg0 : i32 to index
    %c0 = arith.constant 0 : index
    %9 = memref.load %arg1[%8, %c0] : memref<8x2xi32, #tpu.memory_space<smem>>
    %10 = vector.broadcast %9 : i32 to vector<2x128xi32>
    %11 = arith.select %7, %10, %5 : vector<2x128xi1>, vector<2x128xi32>
    %c1_i32 = arith.constant 1 : i32
    %12 = vector.broadcast %c1_i32 : i32 to vector<2x128xi32>
    %13 = arith.cmpi eq, %4, %12 : vector<2x128xi32>
    %14 = arith.index_cast %arg0 : i32 to index
    %c1 = arith.constant 1 : index
    %15 = memref.load %arg1[%14, %c1] : memref<8x2xi32, #tpu.memory_space<smem>>
    %16 = vector.broadcast %15 : i32 to vector<2x128xi32>
    %17 = arith.select %13, %16, %11 : vector<2x128xi1>, vector<2x128xi32>
    %18 = arith.cmpi eq, %3, %17 : vector<2x128xi32>
    %19 = arith.extui %18 : vector<2x128xi1> to vector<2x128xi32>
    %20 = arith.sitofp %19 : vector<2x128xi32> to vector<2x128xf32>
    %21 = arith.truncf %20 : vector<2x128xf32> to vector<2x128xbf16>
    %c0_3 = arith.constant 0 : index
    %c0_4 = arith.constant 0 : index
    %22 = vector.load %arg2[%c0_3, %c0_4] : memref<128x32xbf16, #tpu.memory_space<vmem>>, vector<128x32xbf16>
    %cst = arith.constant dense<0.000000e+00> : vector<2x32xf32>
    %23 = tpu.matmul %21, %22, %cst {dimension_numbers = #tpu.dot_dimension_numbers<[1], [0], [0], [1], [0, 0, 1, 1], [], []>} : vector<2x128xbf16>, vector<128x32xbf16>, vector<2x32xf32> -> vector<2x32xf32>
    %c0_5 = arith.constant 0 : index
    %c0_6 = arith.constant 0 : index
    %c0_7 = arith.constant 0 : index
    %24 = vector.load %arg10[%c0_5, %c0_6, %c0_7] : memref<2x2x32xf32, #tpu.memory_space<vmem>>, vector<1x2x32xf32>
    %25 = vector.shape_cast %24 : vector<1x2x32xf32> to vector<2x32xf32>
    %c0_8 = arith.constant 0 : index
    %c0_9 = arith.constant 0 : index
    %c0_10 = arith.constant 0 : index
    %26 = vector.load %arg11[%c0_8, %c0_9, %c0_10] : memref<2x2x32xf32, #tpu.memory_space<vmem>>, vector<1x2x32xf32>
    %27 = vector.shape_cast %26 : vector<1x2x32xf32> to vector<2x32xf32>
    %28 = arith.truncf %23 : vector<2x32xf32> to vector<2x32xbf16>
    %c0_11 = arith.constant 0 : index
    %c0_12 = arith.constant 0 : index
    %c0_13 = arith.constant 0 : index
    %c0_14 = arith.constant 0 : index
    %29 = vector.load %arg3[%c0_11, %c0_12, %c0_13, %c0_14] : memref<2x2x32x128xbf16, #tpu.memory_space<vmem>>, vector<1x1x32x128xbf16>
    %30 = vector.shape_cast %29 : vector<1x1x32x128xbf16> to vector<32x128xbf16>
    %cst_15 = arith.constant dense<0.000000e+00> : vector<2x128xf32>
    %31 = tpu.matmul %28, %30, %cst_15 {dimension_numbers = #tpu.dot_dimension_numbers<[1], [0], [0], [1], [0, 0, 1, 1], [], []>} : vector<2x32xbf16>, vector<32x128xbf16>, vector<2x128xf32> -> vector<2x128xf32>
    %32 = arith.truncf %25 : vector<2x32xf32> to vector<2x32xbf16>
    %c0_16 = arith.constant 0 : index
    %c1_17 = arith.constant 1 : index
    %c0_18 = arith.constant 0 : index
    %c0_19 = arith.constant 0 : index
    %33 = vector.load %arg3[%c0_16, %c1_17, %c0_18, %c0_19] : memref<2x2x32x128xbf16, #tpu.memory_space<vmem>>, vector<1x1x32x128xbf16>
    %34 = vector.shape_cast %33 : vector<1x1x32x128xbf16> to vector<32x128xbf16>
    %cst_20 = arith.constant dense<0.000000e+00> : vector<2x128xf32>
    %35 = tpu.matmul %32, %34, %cst_20 {dimension_numbers = #tpu.dot_dimension_numbers<[1], [0], [0], [1], [0, 0, 1, 1], [], []>} : vector<2x32xbf16>, vector<32x128xbf16>, vector<2x128xf32> -> vector<2x128xf32>
    %36 = arith.addf %31, %35 : vector<2x128xf32>
    %c0_21 = arith.constant 0 : index
    %c0_22 = arith.constant 0 : index
    %c0_23 = arith.constant 0 : index
    %37 = vector.load %arg4[%c0_21, %c0_22, %c0_23] : memref<2x1x128xf32, #tpu.memory_space<vmem>>, vector<1x1x128xf32>
    %38 = vector.shape_cast %37 : vector<1x1x128xf32> to vector<1x128xf32>
    %39 = vector.broadcast %38 : vector<1x128xf32> to vector<2x128xf32>
    %40 = arith.addf %36, %39 : vector<2x128xf32>
    %41 = vector.extract_strided_slice %40 {offsets = [0, 0], sizes = [2, 32], strides = [1, 1]} : vector<2x128xf32> to vector<2x32xf32>
    %42 = arith.negf %41 : vector<2x32xf32>
    %43 = math.exp %42 : vector<2x32xf32>
    %cst_24 = arith.constant 1.000000e+00 : f32
    %44 = vector.broadcast %cst_24 : f32 to vector<2x32xf32>
    %45 = arith.addf %44, %43 : vector<2x32xf32>
    %46 = arith.divf %44, %45 : vector<2x32xf32>
    %47 = vector.extract_strided_slice %40 {offsets = [0, 32], sizes = [2, 32], strides = [1, 1]} : vector<2x128xf32> to vector<2x32xf32>
    %48 = arith.negf %47 : vector<2x32xf32>
    %49 = math.exp %48 : vector<2x32xf32>
    %cst_25 = arith.constant 1.000000e+00 : f32
    %50 = vector.broadcast %cst_25 : f32 to vector<2x32xf32>
    %51 = arith.addf %50, %49 : vector<2x32xf32>
    %52 = arith.divf %50, %51 : vector<2x32xf32>
    %53 = vector.extract_strided_slice %40 {offsets = [0, 64], sizes = [2, 32], strides = [1, 1]} : vector<2x128xf32> to vector<2x32xf32>
    %54 = math.tanh %53 : vector<2x32xf32>
    %55 = vector.extract_strided_slice %40 {offsets = [0, 96], sizes = [2, 32], strides = [1, 1]} : vector<2x128xf32> to vector<2x32xf32>
    %56 = arith.negf %55 : vector<2x32xf32>
    %57 = math.exp %56 : vector<2x32xf32>
    %cst_26 = arith.constant 1.000000e+00 : f32
    %58 = vector.broadcast %cst_26 : f32 to vector<2x32xf32>
    %59 = arith.addf %58, %57 : vector<2x32xf32>
    %60 = arith.divf %58, %59 : vector<2x32xf32>
    %61 = arith.mulf %52, %27 : vector<2x32xf32>
    %62 = arith.mulf %46, %54 : vector<2x32xf32>
    %63 = arith.addf %61, %62 : vector<2x32xf32>
    %64 = math.tanh %63 : vector<2x32xf32>
    %65 = arith.mulf %60, %64 : vector<2x32xf32>
    %c0_27 = arith.constant 0 : index
    %c0_28 = arith.constant 0 : index
    %c0_29 = arith.constant 0 : index
    %66 = vector.load %arg10[%c0_27, %c0_28, %c0_29] : memref<2x2x32xf32, #tpu.memory_space<vmem>>, vector<1x2x32xf32>
    %67 = vector.shape_cast %66 : vector<1x2x32xf32> to vector<2x32xf32>
    %68 = vector.shape_cast %65 : vector<2x32xf32> to vector<1x2x32xf32>
    tpu.vector_store %arg10[%c0_27, %c0_28, %c0_29], %68 {strides = array<i32>} : memref<2x2x32xf32, #tpu.memory_space<vmem>>, vector<1x2x32xf32>,
    %c0_30 = arith.constant 0 : index
    %c0_31 = arith.constant 0 : index
    %c0_32 = arith.constant 0 : index
    %69 = vector.load %arg11[%c0_30, %c0_31, %c0_32] : memref<2x2x32xf32, #tpu.memory_space<vmem>>, vector<1x2x32xf32>
    %70 = vector.shape_cast %69 : vector<1x2x32xf32> to vector<2x32xf32>
    %71 = vector.shape_cast %63 : vector<2x32xf32> to vector<1x2x32xf32>
    tpu.vector_store %arg11[%c0_30, %c0_31, %c0_32], %71 {strides = array<i32>} : memref<2x2x32xf32, #tpu.memory_space<vmem>>, vector<1x2x32xf32>,
    %c1_33 = arith.constant 1 : index
    %c0_34 = arith.constant 0 : index
    %c0_35 = arith.constant 0 : index
    %72 = vector.load %arg10[%c1_33, %c0_34, %c0_35] : memref<2x2x32xf32, #tpu.memory_space<vmem>>, vector<1x2x32xf32>
    %73 = vector.shape_cast %72 : vector<1x2x32xf32> to vector<2x32xf32>
    %c1_36 = arith.constant 1 : index
    %c0_37 = arith.constant 0 : index
    %c0_38 = arith.constant 0 : index
    %74 = vector.load %arg11[%c1_36, %c0_37, %c0_38] : memref<2x2x32xf32, #tpu.memory_space<vmem>>, vector<1x2x32xf32>
    %75 = vector.shape_cast %74 : vector<1x2x32xf32> to vector<2x32xf32>
    %76 = arith.truncf %65 : vector<2x32xf32> to vector<2x32xbf16>
    %c1_39 = arith.constant 1 : index
    %c0_40 = arith.constant 0 : index
    %c0_41 = arith.constant 0 : index
    %c0_42 = arith.constant 0 : index
    %77 = vector.load %arg3[%c1_39, %c0_40, %c0_41, %c0_42] : memref<2x2x32x128xbf16, #tpu.memory_space<vmem>>, vector<1x1x32x128xbf16>
    %78 = vector.shape_cast %77 : vector<1x1x32x128xbf16> to vector<32x128xbf16>
    %cst_43 = arith.constant dense<0.000000e+00> : vector<2x128xf32>
    %79 = tpu.matmul %76, %78, %cst_43 {dimension_numbers = #tpu.dot_dimension_numbers<[1], [0], [0], [1], [0, 0, 1, 1], [], []>} : vector<2x32xbf16>, vector<32x128xbf16>, vector<2x128xf32> -> vector<2x128xf32>
    %80 = arith.truncf %73 : vector<2x32xf32> to vector<2x32xbf16>
    %c1_44 = arith.constant 1 : index
    %c1_45 = arith.constant 1 : index
    %c0_46 = arith.constant 0 : index
    %c0_47 = arith.constant 0 : index
    %81 = vector.load %arg3[%c1_44, %c1_45, %c0_46, %c0_47] : memref<2x2x32x128xbf16, #tpu.memory_space<vmem>>, vector<1x1x32x128xbf16>
    %82 = vector.shape_cast %81 : vector<1x1x32x128xbf16> to vector<32x128xbf16>
    %cst_48 = arith.constant dense<0.000000e+00> : vector<2x128xf32>
    %83 = tpu.matmul %80, %82, %cst_48 {dimension_numbers = #tpu.dot_dimension_numbers<[1], [0], [0], [1], [0, 0, 1, 1], [], []>} : vector<2x32xbf16>, vector<32x128xbf16>, vector<2x128xf32> -> vector<2x128xf32>
    %84 = arith.addf %79, %83 : vector<2x128xf32>
    %c1_49 = arith.constant 1 : index
    %c0_50 = arith.constant 0 : index
    %c0_51 = arith.constant 0 : index
    %85 = vector.load %arg4[%c1_49, %c0_50, %c0_51] : memref<2x1x128xf32, #tpu.memory_space<vmem>>, vector<1x1x128xf32>
    %86 = vector.shape_cast %85 : vector<1x1x128xf32> to vector<1x128xf32>
    %87 = vector.broadcast %86 : vector<1x128xf32> to vector<2x128xf32>
    %88 = arith.addf %84, %87 : vector<2x128xf32>
    %89 = vector.extract_strided_slice %88 {offsets = [0, 0], sizes = [2, 32], strides = [1, 1]} : vector<2x128xf32> to vector<2x32xf32>
    %90 = arith.negf %89 : vector<2x32xf32>
    %91 = math.exp %90 : vector<2x32xf32>
    %cst_52 = arith.constant 1.000000e+00 : f32
    %92 = vector.broadcast %cst_52 : f32 to vector<2x32xf32>
    %93 = arith.addf %92, %91 : vector<2x32xf32>
    %94 = arith.divf %92, %93 : vector<2x32xf32>
    %95 = vector.extract_strided_slice %88 {offsets = [0, 32], sizes = [2, 32], strides = [1, 1]} : vector<2x128xf32> to vector<2x32xf32>
    %96 = arith.negf %95 : vector<2x32xf32>
    %97 = math.exp %96 : vector<2x32xf32>
    %cst_53 = arith.constant 1.000000e+00 : f32
    %98 = vector.broadcast %cst_53 : f32 to vector<2x32xf32>
    %99 = arith.addf %98, %97 : vector<2x32xf32>
    %100 = arith.divf %98, %99 : vector<2x32xf32>
    %101 = vector.extract_strided_slice %88 {offsets = [0, 64], sizes = [2, 32], strides = [1, 1]} : vector<2x128xf32> to vector<2x32xf32>
    %102 = math.tanh %101 : vector<2x32xf32>
    %103 = vector.extract_strided_slice %88 {offsets = [0, 96], sizes = [2, 32], strides = [1, 1]} : vector<2x128xf32> to vector<2x32xf32>
    %104 = arith.negf %103 : vector<2x32xf32>
    %105 = math.exp %104 : vector<2x32xf32>
    %cst_54 = arith.constant 1.000000e+00 : f32
    %106 = vector.broadcast %cst_54 : f32 to vector<2x32xf32>
    %107 = arith.addf %106, %105 : vector<2x32xf32>
    %108 = arith.divf %106, %107 : vector<2x32xf32>
    %109 = arith.mulf %100, %75 : vector<2x32xf32>
    %110 = arith.mulf %94, %102 : vector<2x32xf32>
    %111 = arith.addf %109, %110 : vector<2x32xf32>
    %112 = math.tanh %111 : vector<2x32xf32>
    %113 = arith.mulf %108, %112 : vector<2x32xf32>
    %c1_55 = arith.constant 1 : index
    %c0_56 = arith.constant 0 : index
    %c0_57 = arith.constant 0 : index
    %114 = vector.load %arg10[%c1_55, %c0_56, %c0_57] : memref<2x2x32xf32, #tpu.memory_space<vmem>>, vector<1x2x32xf32>
    %115 = vector.shape_cast %114 : vector<1x2x32xf32> to vector<2x32xf32>
    %116 = vector.shape_cast %113 : vector<2x32xf32> to vector<1x2x32xf32>
    tpu.vector_store %arg10[%c1_55, %c0_56, %c0_57], %116 {strides = array<i32>} : memref<2x2x32xf32, #tpu.memory_space<vmem>>, vector<1x2x32xf32>,
    %c1_58 = arith.constant 1 : index
    %c0_59 = arith.constant 0 : index
    %c0_60 = arith.constant 0 : index
    %117 = vector.load %arg11[%c1_58, %c0_59, %c0_60] : memref<2x2x32xf32, #tpu.memory_space<vmem>>, vector<1x2x32xf32>
    %118 = vector.shape_cast %117 : vector<1x2x32xf32> to vector<2x32xf32>
    %119 = vector.shape_cast %111 : vector<2x32xf32> to vector<1x2x32xf32>
    tpu.vector_store %arg11[%c1_58, %c0_59, %c0_60], %119 {strides = array<i32>} : memref<2x2x32xf32, #tpu.memory_space<vmem>>, vector<1x2x32xf32>,
    %120 = arith.truncf %113 : vector<2x32xf32> to vector<2x32xbf16>
    %c0_61 = arith.constant 0 : index
    %c0_62 = arith.constant 0 : index
    %121 = vector.load %arg5[%c0_61, %c0_62] : memref<32x128xbf16, #tpu.memory_space<vmem>>, vector<32x128xbf16>
    %cst_63 = arith.constant dense<0.000000e+00> : vector<2x128xf32>
    %122 = tpu.matmul %120, %121, %cst_63 {dimension_numbers = #tpu.dot_dimension_numbers<[1], [0], [0], [1], [0, 0, 1, 1], [], []>} : vector<2x32xbf16>, vector<32x128xbf16>, vector<2x128xf32> -> vector<2x128xf32>
    %c0_64 = arith.constant 0 : index
    %c0_65 = arith.constant 0 : index
    %123 = vector.load %arg6[%c0_64, %c0_65] : memref<1x128xf32, #tpu.memory_space<vmem>>, vector<1x128xf32>
    %124 = vector.broadcast %123 : vector<1x128xf32> to vector<2x128xf32>
    %125 = arith.addf %122, %124 : vector<2x128xf32>
    %cst_66 = arith.constant dense<0xFF800000> : vector<2xf32>
    %126 = vector.multi_reduction <maximumf>, %125, %cst_66 [1] : vector<2x128xf32> to vector<2xf32>
    %127 = vector.shape_cast %126 : vector<2xf32> to vector<2x1xf32>
    %128 = vector.broadcast %127 : vector<2x1xf32> to vector<2x128xf32>
    %129 = arith.subf %125, %128 : vector<2x128xf32>
    %130 = math.exp %129 : vector<2x128xf32>
    %cst_67 = arith.constant dense<0.000000e+00> : vector<2xf32>
    %131 = vector.multi_reduction <add>, %130, %cst_67 [1] : vector<2x128xf32> to vector<2xf32>
    %132 = vector.shape_cast %131 : vector<2xf32> to vector<2x1xf32>
    %133 = vector.broadcast %132 : vector<2x1xf32> to vector<2x128xf32>
    %134 = arith.divf %130, %133 : vector<2x128xf32>
    %c0_68 = arith.constant 0 : index
    %c0_69 = arith.constant 0 : index
    %c0_70 = arith.constant 0 : index
    %135 = vector.load %arg9[%c0_68, %c0_69, %c0_70] : memref<1x2x128xf32, #tpu.memory_space<vmem>>, vector<1x2x128xf32>
    %136 = vector.shape_cast %135 : vector<1x2x128xf32> to vector<2x128xf32>
    %137 = vector.shape_cast %134 : vector<2x128xf32> to vector<1x2x128xf32>
    tpu.vector_store %arg9[%c0_68, %c0_69, %c0_70], %137 {strides = array<i32>} : memref<1x2x128xf32, #tpu.memory_space<vmem>>, vector<1x2x128xf32>,
    return
  }
  func.func @transform_0(%arg0: i32, %arg1: memref<8x2xi32, #tpu.memory_space<smem>>) -> (i32, i32) {
    %c0_i32 = arith.constant 0 : i32
    %c0_i32_0 = arith.constant 0 : i32
    %c0_i32_1 = arith.constant 0 : i32
    return %c0_i32, %c0_i32_0 : i32, i32
  }
  func.func @transform_1(%arg0: i32, %arg1: memref<8x2xi32, #tpu.memory_space<smem>>) -> (i32, i32, i32, i32) {
    %c0_i32 = arith.constant 0 : i32
    %c0_i32_0 = arith.constant 0 : i32
    %c0_i32_1 = arith.constant 0 : i32
    %c0_i32_2 = arith.constant 0 : i32
    %c0_i32_3 = arith.constant 0 : i32
    return %c0_i32, %c0_i32_0, %c0_i32_1, %c0_i32_2 : i32, i32, i32, i32
  }
  func.func @transform_2(%arg0: i32, %arg1: memref<8x2xi32, #tpu.memory_space<smem>>) -> (i32, i32, i32) {
    %c0_i32 = arith.constant 0 : i32
    %c0_i32_0 = arith.constant 0 : i32
    %c0_i32_1 = arith.constant 0 : i32
    %c0_i32_2 = arith.constant 0 : i32
    return %c0_i32, %c0_i32_0, %c0_i32_1 : i32, i32, i32
  }
  func.func @transform_3(%arg0: i32, %arg1: memref<8x2xi32, #tpu.memory_space<smem>>) -> (i32, i32) {
    %c0_i32 = arith.constant 0 : i32
    %c0_i32_0 = arith.constant 0 : i32
    %c0_i32_1 = arith.constant 0 : i32
    return %c0_i32, %c0_i32_0 : i32, i32
  }
  func.func @transform_4(%arg0: i32, %arg1: memref<8x2xi32, #tpu.memory_space<smem>>) -> (i32, i32) {
    %c0_i32 = arith.constant 0 : i32
    %c0_i32_0 = arith.constant 0 : i32
    %c0_i32_1 = arith.constant 0 : i32
    return %c0_i32, %c0_i32_0 : i32, i32
  }
  func.func @transform_5(%arg0: i32, %arg1: memref<8x2xi32, #tpu.memory_space<smem>>) -> (i32, i32, i32) {
    %c0_i32 = arith.constant 0 : i32
    %c0_i32_0 = arith.constant 0 : i32
    %c0_i32_1 = arith.constant 0 : i32
    %c0_i32_2 = arith.constant 0 : i32
    return %c0_i32, %c0_i32_0, %c0_i32_1 : i32, i32, i32
  }
  func.func @transform_6(%arg0: i32, %arg1: memref<8x2xi32, #tpu.memory_space<smem>>) -> (i32, i32, i32) {
    %c0_i32 = arith.constant 0 : i32
    %c0_i32_0 = arith.constant 0 : i32
    %c0_i32_1 = arith.constant 0 : i32
    %c0_i32_2 = arith.constant 0 : i32
    return %c0_i32, %c0_i32_0, %c0_i32_1 : i32, i32, i32
  }
  func.func @transform_7(%arg0: i32, %arg1: memref<8x2xi32, #tpu.memory_space<smem>>) -> (i32, i32, i32) {
    %c0_i32 = arith.constant 0 : i32
    %c0_i32_0 = arith.constant 0 : i32
    %c0_i32_1 = arith.constant 0 : i32
    return %arg0, %c0_i32, %c0_i32_0 : i32, i32, i32
  }
  func.func @transform_8(%arg0: i32, %arg1: memref<8x2xi32, #tpu.memory_space<smem>>) -> (i32, i32, i32) {
    %c0_i32 = arith.constant 0 : i32
    %c0_i32_0 = arith.constant 0 : i32
    %c0_i32_1 = arith.constant 0 : i32
    %c0_i32_2 = arith.constant 0 : i32
    return %c0_i32, %c0_i32_0, %c0_i32_1 : i32, i32, i32
  }
  func.func @transform_9(%arg0: i32, %arg1: memref<8x2xi32, #tpu.memory_space<smem>>) -> (i32, i32, i32) {
    %c0_i32 = arith.constant 0 : i32
    %c0_i32_0 = arith.constant 0 : i32
    %c0_i32_1 = arith.constant 0 : i32
    %c0_i32_2 = arith.constant 0 : i32
    return %c0_i32, %c0_i32_0, %c0_i32_1 : i32, i32, i32
  }
}

</mosaic_0001>

<bundles_post_ra>
// kernel: tpu_custom_call.1
= control target key start
LH: loop header
LB: loop body
LE: loop exit
PB: predicated region body
PF: predicated region fallthrough
CT: control target
= control target key end

     0   :  { %s1677_s0 = inlined_call_operand.vmem [shape: s32[8,2], index: 0, kind: input, shape index: {}]   ;;  %s1678_s1 = inlined_call_operand.vmem [shape: bf16[128,32], index: 1, kind: input, shape index: {}]   ;;  %s1679_s2 = inlined_call_operand.vmem [shape: bf16[2,2,32,128], index: 2, kind: input, shape index: {}]   ;;  %s1680_s3 = inlined_call_operand.vmem [shape: f32[2,1,128], index: 3, kind: input, shape index: {}]   ;;  %s1681_s4 = inlined_call_operand.vmem [shape: bf16[32,128], index: 4, kind: input, shape index: {}]   ;;  %s1682_s5 = inlined_call_operand.vmem [shape: f32[1,128], index: 5, kind: input, shape index: {}]   ;;  %s1683_s6 = inlined_call_operand.vmem [shape: f32[2,2,32], index: 6, kind: input, shape index: {}]   ;;  %s1684_s7 = inlined_call_operand.vmem [shape: f32[2,2,32], index: 7, kind: input, shape index: {}]   ;;  %s1685_s8 = inlined_call_operand.hbm [shape: f32[8,2,128], index: 8, kind: output, shape index: {0}]   ;;  %s1686_s9 = inlined_call_operand.hbm [shape: f32[2,2,32], index: 9, kind: output, shape index: {1}]   ;;  %s1687_s10 = inlined_call_operand.hbm [shape: f32[2,2,32], index: 10, kind: output, shape index: {2}]  }
   0x1   :  { %1690 = sst [smem:[#allocation12_spill]] %s1678_s1  ;;  %s16_s15 = sshll.u32 %s1677_s0, 4  ;;  %s17_s15 = int_to_ptr.vmem [resolvable:$true] %s16_s15 }
   0x2   :  { %1691 = sst [smem:[#allocation13_spill]] %s1679_s2  ;;  %s1229_s16 = scalar_lea.vmem %s17_s15, 128 }
   0x3   :  { %p1230_p0 = scmp.ne.s32.totalorder %s17_s15, %s1229_s16  ;;  %p1234_p1 = scmp.lt.s32.totalorder %s17_s15, %s17_s15 }
   0x4   :  { %p1235_p2 = scmp.lt.s32.totalorder %s1229_s16, %s1229_s16 }
   0x6   :  { %p1236_p3 = por %p1235_p2, %p1234_p1 }
   0x8   :  { %p1237_p4 = pnand %p1236_p3, %p1230_p0 }
   0xa   :  { %1240 = shalt.err (!%p1237_p4)  }
   0xb   :  { %s1357_s17 = smov [#allocation3]  }
   0xc   :  { %19 = dma.vmem_to_smem %s17_s15, 128, %s1357_s17, [#allocation2] }
   0xd   :  { %1331 = dma.done.wait [#allocation2], 128 }
   0xe   :  { %1332 = vsyncadd [#allocation2], 4294967168 }
   0xf   :  { %21 = sfence }
  0x10   :  { %22 = vsyncpa [#allocation5], 0 }
  0x11   :  { %24 = vsyncpa [#allocation5 + $0x1], 0 }
  0x12   :  { %25 = vsyncpa [#allocation7], 0  ;;  %s1426_s18 = smov 0   ;;  %s1428_s19 = smov 0  }
  0x13   :  { %s1430_s0 = smov 0   ;;  %s1432_s20 = smov 0  }
  0x14 LB: > { %s1447_s21 = sadd.s32 4294967295, %s1355_s20   ;;  %s988_s22 = sadd.s32 4294967294, %s1355_s20   ;;  %s1355_s20 = sphi %s1432_s20, %s1704_s20   ;;  %s1351_s0 = sphi %s1430_s0, %s1703_s0   ;;  %s1347_s19 = sphi %s1428_s19, %s1702_s19   ;;  %s1343_s18 = sphi %s1426_s18, %s1701_s18  }
  0x15   : > { %s1451_s23 = sadd.s32 1, %s1355_s20   ;;  %s185_s24 = sadd.s32 1, %s1351_s0 }
  0x16   : > { %s182_s25 = ssub.s32 %s1355_s20, %s1451_s23  ;;  %p195_p5 = scmp.ne.s32.totalorder %s1351_s0, %s1347_s19 }
  0x17   : > { %p183_p6 = scmp.eq.s32.totalorder %s182_s25, 0  ;;  %p1689_p7 = scmp.eq.s32.totalorder %s1447_s21, 7 }
  0x18   : > { %p201_p8 = scmp.ne.s32.totalorder %s1347_s19, %s1343_s18  ;;  %p202_p9 = scmp.eq.s32.totalorder %s988_s22, 7 }
  0x19   : > { %s1462_s26 = scalar_select %p183_p6, %s1351_s0, %s185_s24  }
  0x1a   : > { %p1466_p10 = por %p1689_p7, %p195_p5  ;;  %p1470_p11 = por %p202_p9, %p201_p8 }
  0x1b   : > { %p990_p12 = scmp.ge.s32.totalorder %s1355_s20, 1  ;;  %p283_p13 = scmp.lt.s32.totalorder %s1355_s20, 9 }
  0x1d   : > { %p284_p0 = pnand %p990_p12, %p283_p13 }
  0x1e   : > { %s1688_s29 = sand.u32 (!%p284_p0), 1, %s1347_s19   ;;  %p992_p1 = scmp.ne.s32.totalorder (!%p284_p0), %s1447_s21, 0 }
  0x1f   : > { %287 = sbr.rel (%p284_p0) target bundleno = 2192 (0x890), region = 48  ;;  %s1479_s30 = sshll.u32 (!%p284_p0), %s1688_s29, 1 }
  0x24   : > { %318 = sbr.rel (%p992_p1) target bundleno = 45 (0x2d), region = 52 }
  0x29   : > { %v319_v0 = vld [vmem:[%s1683_s6] sm:$0x3]  ;;  %vm321_vm0 = vcmask 254976   ;;  %v320_v1 = vld [vmem:[%s1683_s6 + $0x2] sm:$0x3] }
  0x2a   : > { %322 = vst.msk [vmem:[#allocation6] sm:$0x3] %vm321_vm0, %v319_v0  ;;  %323 = vst.msk [vmem:[#allocation6 + $0x2] sm:$0x3] %vm321_vm0, %v320_v1  ;;  %v324_v2 = vld [vmem:[%s1684_s7] sm:$0x3] }
  0x2b   : > { %v325_v3 = vld [vmem:[%s1684_s7 + $0x2] sm:$0x3]  ;;  %326 = vst.msk [vmem:[#allocation8] sm:$0x3] %vm321_vm0, %v324_v2 }
  0x2c   : > { %327 = vst.msk [vmem:[#allocation8 + $0x2] sm:$0x3] %vm321_vm0, %v325_v3 }
  0x2d PF: > { %s1694_s1 = sld [smem:[#allocation12_spill]]  ;;  %v1358_v5 = vmov 0.0   ;;  %vm1359_vm1 = vmmov 0   ;;  %v328_v7 = vlaneseq  ;;  %s993_s17 = sshll.u32 %s1447_s21, 7  ;;  %vm475_vm2 = vcmask 261120  }
  0x2e   : > { %1070 = vmatprep.subr.bf16.mxu0 %v1358_v5  ;;  %1090 = vmatprep.subr.bf16.mxu1 %v1358_v5  ;;  %s1695_s2 = sld [smem:[#allocation13_spill]]  ;;  %s338_s13 = sadd.s32 1, %s993_s17  ;;  %v1360_v26 = vmov 1.0|1.0   ;;  %v1015_v37 = vld [vmem:[%s1680_s3] ss:$0 sm:$0xff] }
  0x2f   : > { %1086 = vmatprep.mubr.msk.bf16.mxu0 %vm1359_vm1, %v1358_v5  ;;  %1094 = vmatprep.mubr.msk.bf16.mxu1 %vm1359_vm1, %v1358_v5  ;;  %v331_v11 = vshrl.u32 %v328_v7, 7  ;;  %s334_s14 = sld [smem:[#allocation3 + %s993_s17]]  ;;  %v329_v23 = vand.u32 127, %v328_v7  ;;  %s1361_s25 = smov 64   ;;  %vm614_vm7 = vcmask 254976   ;;  %vm867_vm8 = vcmask 1041408  }
  0x30   : > { %s339_s22 = sld [smem:[#allocation3 + %s338_s13]]  ;;  %s1362_s29 = smov 32  }
  0x31   : > { %v450_v13 = vld [vmem:[#allocation6] sm:$0x3]  ;;  %vm332_vm3 = vcmp.eq.s32.totalorder %v331_v11, 0  ;;  %vm337_vm4 = vcmp.eq.s32.totalorder %v331_v11, 1  ;;  %v622_v57 = vld [vmem:[#allocation6 + $0x2] sm:$0x3] }
  0x32   : > { %v457_v15 = vpack.c.bf16 %v450_v13, %v450_v13  ;;  %v451_v44 = vld [vmem:[#allocation8] sm:$0x3]  ;;  %v631_v58 = vpack.c.bf16 %v622_v57, %v622_v57 }
  0x33   : > { %v1191_v4 = vld [vmem:[%s1694_s1 + $0x38] sm:$0xff]   ;;  %v1192_v6 = vld [vmem:[%s1694_s1 + $0x30] sm:$0xff]   ;;  %v1193_v8 = vld [vmem:[%s1694_s1 + $0x28] sm:$0xff]  }
  0x34   : > { %1071 = vmatpush3.bf16.msra.mxu0 %v1191_v4  ;;  %v1194_v9 = vld [vmem:[%s1694_s1 + $0x20] sm:$0xff]   ;;  %v1199_v10 = vld [vmem:[%s1695_s2 + $0x18] sm:$0xff]   ;;  %v1200_v12 = vld [vmem:[%s1695_s2 + $0x10] sm:$0xff]  }
  0x35   : > { %1072 = vmatprep.subr.bf16.mxu0 %v1358_v5  ;;  %1091 = vmatpush3.bf16.msra.mxu1 %v1199_v10  ;;  %v1195_v14 = vld [vmem:[%s1694_s1 + $0x18] sm:$0xff]   ;;  %v1201_v16 = vld [vmem:[%s1695_s2 + $0x8] sm:$0xff]   ;;  %v1196_v17 = vld [vmem:[%s1694_s1 + $0x10] sm:$0xff]   ;;  %v335_v18 = vstv %s334_s14 }
  0x36   : > { %1092 = vmatprep.subr.bf16.mxu1 %v1358_v5  ;;  %v1202_v19 = vld [vmem:[%s1695_s2] sm:$0xff]   ;;  %v336_v20 = vsel %vm332_vm3, %v335_v18, 0  ;;  %v340_v21 = vstv %s339_s22  ;;  %v1197_v22 = vld [vmem:[%s1694_s1 + $0x8] sm:$0xff]   ;;  %v1203_v55 = vld [vmem:[%s1695_s2 + $0x38] sm:$0xff]   ;;  %s1364_s22 = smov [#allocation6]  }
  0x37   : > { %v341_v24 = vsel %vm337_vm4, %v340_v21, %v336_v20  ;;  %v1198_v25 = vld [vmem:[%s1694_s1] sm:$0xff]   ;;  %v1204_v56 = vld [vmem:[%s1695_s2 + $0x30] sm:$0xff]   ;;  %v1205_v59 = vld [vmem:[%s1695_s2 + $0x28] sm:$0xff]   ;;  %s904_s24 = sshll.u32 %s1364_s22, 4  ;;  %s905_s24 = int_to_ptr.vmem [resolvable:$true] %s904_s24 }
  0x38   : > { %1073 = vmatpush3.bf16.msra.mxu0 %v1192_v6  ;;  %vm342_vm5 = vcmp.eq.s32.totalorder %v329_v23, %v341_v24  ;;  %v1206_v61 = vld [vmem:[%s1695_s2 + $0x20] sm:$0xff]   ;;  %v624_v1 = vld [vmem:[#allocation8 + $0x2] sm:$0x3]  ;;  %s1241_s11 = scalar_lea.vmem %s905_s24, 64  ;;  %p1248_p5 = scmp.lt.s32.totalorder %s905_s24, %s905_s24 }
  0x39   : > { %1074 = vmatprep.subr.bf16.mxu0 %v1358_v5  ;;  %1093 = vmatpush3.bf16.msra.mxu1 %v1200_v12  ;;  %vm1003_vm6 = vmpackc.low %vm342_vm5, %vm342_vm5  ;;  %p1242_p2 = scmp.ne.s32.totalorder %s905_s24, %s1241_s11  ;;  %p1249_p6 = scmp.lt.s32.totalorder %s1241_s11, %s1241_s11 }
  0x3a   : > { %1098 = vmatprep.subr.bf16.mxu1 %v1358_v5 }
  0x3b   : > { %p1243_p3 = pnand %p1242_p2, %p1689_p7  ;;  %p1250_p8 = por %p1249_p6, %p1248_p5 }
  0x3c   : > { %1075 = vmatpush3.bf16.msra.mxu0 %v1193_v8  ;;  %1095 = vmatmul.mubr.msk.bf16.vlgmr.msra.gmra.mxu1 %vm475_vm2, %v457_v15 }
  0x3d   : > { %1076 = vmatprep.subr.bf16.mxu0 %v1358_v5  ;;  %1099 = vmatpush3.bf16.msra.mxu1 %v1201_v16  ;;  %p1244_p4 = pneg %p1243_p3 }
  0x3e   : > { %1100 = vmatprep.subr.bf16.mxu1 %v1358_v5  ;;  %1102 = vmatprep.mubr.msk.bf16.mxu1 %vm1359_vm1, %v1358_v5 }
  0x3f   : > { %p1251_p9 = pnand %p1250_p8, %p1244_p4 }
  0x40   : > { %1077 = vmatpush3.bf16.msra.mxu0 %v1194_v9  ;;  %v1032_v9 = vld [vmem:[%s1680_s3 + $0x1] ss:$0 sm:$0xff] }
  0x41   : > { %1078 = vmatprep.subr.bf16.mxu0 %v1358_v5  ;;  %1101 = vmatpush3.bf16.msra.mxu1 %v1202_v19 }
  0x42   : > { %1106 = vmatprep.subr.bf16.mxu1 %v1358_v5 }
  0x44   : > { %1079 = vmatpush3.bf16.msra.mxu0 %v1195_v14 }
  0x45   : > { %1080 = vmatprep.subr.bf16.mxu0 %v1358_v5 }
  0x48   : > { %1081 = vmatpush3.bf16.msra.mxu0 %v1196_v17 }
  0x49   : > { %1082 = vmatprep.subr.bf16.mxu0 %v1358_v5 }
  0x4c   : > { %1083 = vmatpush3.bf16.msra.mxu0 %v1197_v22 }
  0x4d   : > { %1084 = vmatprep.subr.bf16.mxu0 %v1358_v5 }
  0x50   : > { %1085 = vmatpush3.bf16.msra.mxu0 %v1198_v25 }
  0x51   : > { %1122 = vmatprep.subr.bf16.mxu0 %v1358_v5 }
  0x53   : > { %1087 = vmatmul.mubr.msk.bf16.vlgmr.msra.gmra.mxu0 %vm1003_vm6, %v1360_v26  ;;  %v1207_v26 = vld [vmem:[%s1681_s4 + $0x8] sm:$0xff]  }
  0x54   : > { %1126 = vmatprep.mubr.msk.bf16.mxu0 %vm1359_vm1, %v1358_v5  ;;  %1123 = vmatpush3.bf16.msra.mxu0 %v1207_v26 }
  0x55   : > { %1124 = vmatprep.subr.bf16.mxu0 %v1358_v5 }
  0xfc   : > { %v513_v27 = vpop.f32.mrf.mxu1 }
  0xfe   : > { %v1096_v28 = vpop.f32.mrf.mxu1 }
 0x100   : > { %v516_v29 = vpop.f32.mrf.mxu1 }
 0x102   : > { %v1097_v30 = vpop.f32.mrf.mxu1 }
 0x113   : > { %v444_v31 = vpop.f32.mrf.mxu0 }
 0x114   : > { %v452_v32 = vpack.c.bf16 %v444_v31, %v444_v31 }
 0x115   : > { %v1088_v33 = vpop.f32.mrf.mxu0 }
 0x116   : > { %1103 = vmatmul.mubr.msk.bf16.vlgmr.msra.gmra.mxu1 %vm475_vm2, %v452_v32 }
 0x117   : > { %v447_v34 = vpop.f32.mrf.mxu0  ;;  %1110 = vmatprep.mubr.msk.bf16.mxu1 %vm1359_vm1, %v1358_v5  ;;  %1107 = vmatpush3.bf16.msra.mxu1 %v1203_v55 }
 0x118   : > { %1108 = vmatprep.subr.bf16.mxu1 %v1358_v5 }
 0x119   : > { %v1089_v35 = vpop.f32.mrf.mxu0 }
 0x11b   : > { %1109 = vmatpush3.bf16.msra.mxu1 %v1204_v56 }
 0x11c   : > { %1114 = vmatprep.subr.bf16.mxu1 %v1358_v5 }
 0x11e   : > { %1111 = vmatmul.mubr.msk.bf16.vlgmr.msra.gmra.mxu1 %vm475_vm2, %v631_v58 }
 0x11f   : > { %1115 = vmatpush3.bf16.msra.mxu1 %v1205_v59  ;;  %1118 = vmatprep.mubr.msk.bf16.mxu1 %vm1359_vm1, %v1358_v5 }
 0x120   : > { %1116 = vmatprep.subr.bf16.mxu1 %v1358_v5  ;;  %v1034_v5 = vld [vmem:[%s1682_s5] ss:$0 sm:$0xff] }
 0x123   : > { %1117 = vmatpush3.bf16.msra.mxu1 %v1206_v61 }
 0x1d6   : > { %v568_v36 = vpop.f32.mrf.mxu1 }
 0x1d7   : > { %v569_v38 = vadd.f32 %v568_v36, %v513_v27  ;;  %v1208_v27 = vld [vmem:[%s1681_s4] sm:$0xff]  }
 0x1d8   : > { %v1104_v39 = vpop.f32.mrf.mxu1  ;;  %1125 = vmatpush3.bf16.msra.mxu0 %v1208_v27 }
 0x1d9   : > { %v581_v40 = vadd.f32 %v1015_v37, %v569_v38 }
 0x1da   : > { %v571_v41 = vpop.f32.mrf.mxu1 }
 0x1db   : > { %1209 = vtanh.f32 %v581_v40  ;;  %v1016_v45 = vmul.f32 -1.442695, %v581_v40 }
 0x1dc   : > { %v1105_v42 = vpop.f32.mrf.mxu1 }
 0x1dd   : > { %1211 = vpow2.f32 %v1016_v45 }
 0x1de   : > { %v686_v2 = vpop.f32.mrf.mxu1 }
 0x1e0   : > { %v1112_v3 = vpop.f32.mrf.mxu1 }
 0x1e2   : > { %v689_v4 = vpop.f32.mrf.mxu1 }
 0x1e4   : > { %v1113_v6 = vpop.f32.mrf.mxu1 }
 0x1e8   : > { %v1210_v43 = vpop.eup %1209 }
 0x1e9   : > { %595 = vrot.lane.b32.xlu0 %v1210_v43, %s1361_s25 }
 0x1ea   : > { %v1212_v46 = vpop.eup %1211 }
 0x1eb   : > { %v585_v47 = vadd.f32 1.0, %v1212_v46 }
 0x1ed   : > { %590 = vrot.lane.b32.xlu0 %v451_v44, %s1362_s29  ;;  %1213 = vrcp.f32 %v585_v47 }
 0x1fa   : > { %v1214_v48 = vpop.eup %1213 }
 0x25b   : > { %v596_v49 = vpop.permute.xlu0 %595 }
 0x25c   : > { %v598_v50 = vmul.f32 %v1214_v48, %v596_v49 }
 0x25e   : > { %600 = vrot.lane.b32.xlu1 %v598_v50, %s1362_s29 }
 0x25f   : > { %v591_v51 = vpop.permute.xlu0 %590 }
 0x260   : > { %v593_v52 = vmul.f32 %v1214_v48, %v591_v51 }
 0x2d0   : > { %v601_v53 = vpop.permute.xlu1 %600 }
 0x2d1   : > { %v1564_v54 = vadd.f32 %v601_v53, %v593_v52 }
 0x2d3   : > { %1215 = vtanh.f32 %v1564_v54 }
 0x2e0   : > { %v1216_v60 = vpop.eup %1215 }
 0x2e1   : > { %606 = vrot.lane.b32.xlu1 %v1216_v60, %s1361_s25 }
 0x353   : > { %v607_v62 = vpop.permute.xlu1 %606 }
 0x354   : > { %v609_v63 = vmul.f32 %v1214_v48, %v607_v62 }
 0x356   : > { %v625_v0 = vpack.c.bf16 %v609_v63, %v609_v63 }
 0x358   : > { %693 = vrot.lane.b32.xlu0 %v625_v0, %s1362_s29 }
 0x35c   : > { %767 = vrot.lane.b32.xlu0 %v624_v1, %s1362_s29 }
 0x3ca   : > { %v694_v7 = vpop.permute.xlu0 %693 }
 0x3cb   : > { %1119 = vmatmul.mubr.msk.bf16.vlgmr.msra.gmra.mxu1 %vm475_vm2, %v694_v7 }
 0x3ce   : > { %v768_v22 = vpop.permute.xlu0 %767 }
 0x48b   : > { %v744_v8 = vpop.f32.mrf.mxu1 }
 0x48c   : > { %v745_v10 = vadd.f32 %v744_v8, %v686_v2 }
 0x48d   : > { %v1120_v11 = vpop.f32.mrf.mxu1 }
 0x48e   : > { %v758_v12 = vadd.f32 %v1032_v9, %v745_v10 }
 0x48f   : > { %v747_v13 = vpop.f32.mrf.mxu1 }
 0x490   : > { %1217 = vtanh.f32 %v758_v12  ;;  %v1033_v16 = vmul.f32 -1.442695, %v758_v12 }
 0x491   : > { %v1121_v14 = vpop.f32.mrf.mxu1 }
 0x492   : > { %1219 = vpow2.f32 %v1033_v16 }
 0x49d   : > { %v1218_v15 = vpop.eup %1217 }
 0x49e   : > { %772 = vrot.lane.b32.xlu1 %v1218_v15, %s1361_s25 }
 0x49f   : > { %v1220_v17 = vpop.eup %1219 }
 0x4a0   : > { %v762_v18 = vadd.f32 1.0, %v1220_v17 }
 0x4a2   : > { %1221 = vrcp.f32 %v762_v18 }
 0x4af   : > { %v1222_v19 = vpop.eup %1221 }
 0x4b0   : > { %v770_v23 = vmul.f32 %v1222_v19, %v768_v22 }
 0x510   : > { %v773_v20 = vpop.permute.xlu1 %772 }
 0x511   : > { %v775_v21 = vmul.f32 %v1222_v19, %v773_v20 }
 0x513   : > { %777 = vrot.lane.b32.xlu1 %v775_v21, %s1362_s29 }
 0x585   : > { %v778_v24 = vpop.permute.xlu1 %777 }
 0x586   : > { %v780_v25 = vadd.f32 %v778_v24, %v770_v23 }
 0x588   : > { %1223 = vtanh.f32 %v780_v25 }
 0x595   : > { %v1224_v28 = vpop.eup %1223 }
 0x596   : > { %783 = vrot.lane.b32.xlu0 %v1224_v28, %s1361_s25  ;;  %s1363_s25 = smov 96  }
 0x608   : > { %v784_v29 = vpop.permute.xlu0 %783 }
 0x609   : > { %v786_v30 = vmul.f32 %v1222_v19, %v784_v29 }
 0x60b   : > { %v797_v31 = vpack.c.bf16 %v786_v30, %v786_v30 }
 0x60d   : > { %810 = vrot.lane.b32.xlu1 %v797_v31, %s1362_s29 }
 0x611   : > { %788 = vrot.lane.b32.xlu1 %v786_v30, %s1362_s29 }
 0x67f   : > { %v811_v32 = vpop.permute.xlu1 %810 }
 0x680   : > { %1127 = vmatmul.mubr.msk.bf16.vlgmr.msra.gmra.mxu0 %vm475_vm2, %v811_v32 }
 0x683   : > { %v789_v33 = vpop.permute.xlu1 %788 }
 0x684   : > { %791 = vst.msk [vmem:[#allocation6 + $0x2] sm:$0x3] %vm614_vm7, %v789_v33 }
 0x740   : > { %v861_v34 = vpop.f32.mrf.mxu0 }
 0x741   : > { %v862_v35 = vadd.f32 %v1034_v5, %v861_v34 }
 0x742   : > { %v1128_v36 = vpop.f32.mrf.mxu0 }
 0x743   : > { %v868_v37 = vsel %vm867_vm8, %v862_v35, -inf }
 0x744   : > { %869 = vmax.xlane.f32.xlu0 %v868_v37  ;;  %v864_v38 = vpop.f32.mrf.mxu0 }
 0x746   : > { %v1129_v39 = vpop.f32.mrf.mxu0 }
 0x75a   : > { %611 = vrot.lane.b32.xlu0 %v609_v63, %s1362_s29 }
 0x75e   : > { %617 = vrot.lane.b32.xlu0 %v1564_v54, %s1363_s25 }
 0x7cd   : > { %v870_v40 = vpop.xlane.xlu0 %869 }
 0x7ce   : > { %v871_v41 = vsub.f32 %v862_v35, %v870_v40 }
 0x7d0   : > { %v872_v42 = vmul.f32 1.442695, %v871_v41 }
 0x7d1   : > { %v612_v43 = vpop.permute.xlu0 %611 }
 0x7d2   : > { %1225 = vpow2.f32 %v872_v42  ;;  %615 = vst.msk [vmem:[#allocation6] sm:$0x3] %vm614_vm7, %v612_v43 }
 0x7d5   : > { %v618_v44 = vpop.permute.xlu0 %617 }
 0x7d6   : > { %620 = vst.msk [vmem:[#allocation8] sm:$0x3] %vm614_vm7, %v618_v44 }
 0x7df   : > { %v1226_v45 = vpop.eup %1225 }
 0x7e0   : > { %v874_v46 = vsel %vm867_vm8, %v1226_v45, 0.0 }
 0x7e1   : > { %875 = vadd.xlane.f32.xlu1 %v874_v46 }
 0x7f2   : > { %793 = vrot.lane.b32.xlu1 %v780_v25, %s1363_s25 }
 0x7f3   : > { %1254 = shalt.err (!%p1251_p9)
}
 0x7f4   : > { %s1365_s17 = smov 2   ;;  %s1366_s15 = smov [#allocation8]  }
 0x7f5   : > { %1132 = dma.vmem_to_hbm [thread:$0]  (%p1689_p7), %s905_s24, 64, %s1686_s9, [#allocation7], %s1362_s29, %s1362_s29, %s1365_s17  }
 0x7f6   : > { %s917_s14 = sshll.u32 %s1366_s15, 4  ;;  %s918_s14 = int_to_ptr.vmem [resolvable:$true] %s917_s14 }
 0x7f7   : > { %s1265_s16 = scalar_lea.vmem %s918_s14, 64  ;;  %p1272_p1 = scmp.lt.s32.totalorder %s918_s14, %s918_s14 }
 0x7f8   : > { %p1266_p12 = scmp.ne.s32.totalorder %s918_s14, %s1265_s16  ;;  %p1273_p2 = scmp.lt.s32.totalorder %s1265_s16, %s1265_s16 }
 0x7fa   : > { %p1267_p13 = pnand %p1266_p12, %p1689_p7  ;;  %p1274_p3 = por %p1273_p2, %p1272_p1 }
 0x7fc   : > { %p1268_p0 = pneg %p1267_p13 }
 0x7fe   : > { %p1275_p4 = pnand %p1274_p3, %p1268_p0 }
 0x86a   : > { %v876_v47 = vpop.xlane.xlu1 %875 }
 0x86b   : > { %1227 = vrcp.f32 %v876_v47 }
 0x86e   : > { %v794_v48 = vpop.permute.xlu1 %793 }
 0x86f   : > { %796 = vst.msk [vmem:[#allocation8 + $0x2] sm:$0x3] %vm614_vm7, %v794_v48 }
 0x870   : > { %1278 = shalt.err (!%p1275_p4)
}
 0x871   : > { %1134 = dma.vmem_to_hbm [thread:$0]  (%p1689_p7), %s918_s14, 64, %s1687_s10, [#allocation7], %s1362_s29, %s1362_s29, %s1365_s17  }
 0x872   : > { %s1039_s24 = sshll.u32 %s1447_s21, 5  ;;  %s1696_s11 = scalar_lea.vmem [#allocation4], %s1479_s30 }
 0x873   : > { %s894_s12 = sshll.u32 %s1696_s11, 4  ;;  %s892_s16 = scalar_lea.hbm %s1685_s8, %s1039_s24  ;;  %s895_s12 = int_to_ptr.vmem [resolvable:$true] %s894_s12 }
 0x874   : > { %s1697_s1 = smov %s1696_s11  ;;  %s1698_s2 = sand.u32 1, %s1347_s19  }
 0x875   : > { %s881_s25 = scalar_lea.sflag [#allocation5], %s1698_s2  ;;  %s1289_s22 = scalar_lea.vmem %s895_s12, 32 }
 0x876   : > { %p1290_p5 = scmp.ne.s32.totalorder %s895_s12, %s1289_s22  ;;  %s1367_s29 = smov [#allocation4]  }
 0x877   : > { %s1293_s17 = sshll.u32 %s1367_s29, 4  ;;  %s1294_s17 = int_to_ptr.vmem [resolvable:$false] %s1293_s17 }
 0x878   : > { %v1228_v49 = vpop.eup %1227  ;;  %p1291_p6 = pnand %p1290_p5, %p1466_p10  ;;  %s1295_s14 = scalar_lea.vmem %s1294_s17, 64 }
 0x879   : > { %v878_v50 = vmul.f32 %v1228_v49, %v1226_v45  ;;  %p1296_p9 = scmp.lt.s32.totalorder %s895_s12, %s1294_s17  ;;  %p1297_p12 = scmp.lt.s32.totalorder %s1295_s14, %s1289_s22 }
 0x87a   : > { %p1292_p8 = pneg %p1291_p6 }
 0x87b   : > { %879 = vst [vmem:[%s1697_s1] sm:$0x3] %v878_v50  ;;  %p1298_p13 = por %p1297_p12, %p1296_p9 }
 0x87d   : > { %p1299_p0 = pnand %p1298_p13, %p1292_p8 }
 0x87f   : > { %1302 = shalt.err (!%p1299_p0)
}
 0x880   : > { %s1303_s24 = scalar_lea.hbm %s892_s16, 32  ;;  %s1307_s30 = scalar_lea.hbm %s1685_s8, 256 }
 0x881   : > { %p1304_p1 = scmp.ne.s32.totalorder %s892_s16, %s1303_s24  ;;  %p1308_p4 = scmp.lt.s32.totalorder %s892_s16, %s1685_s8 }
 0x882   : > { %p1309_p5 = scmp.lt.s32.totalorder %s1307_s30, %s1303_s24 }
 0x883   : > { %p1305_p2 = pnand %p1304_p1, %p1466_p10 }
 0x884   : > { %p1310_p6 = por %p1309_p5, %p1308_p4 }
 0x885   : > { %p1306_p3 = pneg %p1305_p2 }
 0x887   : > { %p1311_p7 = pnand %p1310_p6, %p1306_p3 }
 0x889   : > { %1314 = shalt.err (!%p1311_p7)
}
 0x88a   : > { %1130 = dma.vmem_to_hbm [thread:$0]  (%p1466_p10), %s895_s12, 32, %s892_s16, %s881_s25  }
 0x88b   : > { %p1699_p8 = scmp.eq.s32.totalorder %s1447_s21, 7 }
 0x88d   : > { %1334 = dma.done.wait (%p1699_p8), [#allocation7], 128   ;;  %p1700_p9 = pmov %p1699_p8 }
 0x88f   : > { %1336 = vsyncadd (%p1700_p9), [#allocation7], 4294967168 }
 0x890 PF: > { %p1148_p12 = scmp.ge.s32.totalorder %s1355_s20, 2  ;;  %s940_s15 = sand.u32 1, %s1343_s18  }
 0x891   : > { %s941_s22 = scalar_lea.sflag [#allocation5], %s940_s15 }
 0x892   : > { %p1141_p13 = pnand %p1148_p12, %p1470_p11 }
 0x894   : > { %p1142_p0 = pneg %p1141_p13 }
 0x896   : > { %1338 = dma.done.wait (%p1142_p0), %s941_s22, 32  }
 0x897   : > { %1340 = vsyncadd (%p1142_p0), %s941_s22, 4294967264  ;;  %p28_p7 = scmp.ge.s32.totalorder %s1451_s23, 10   ;;  %s1701_s18 = smov %s1347_s19 }
 0x898   : > { %s1702_s19 = smov %s1351_s0  ;;  %s1703_s0 = smov %s1462_s26 }
 0x899   : > { %s1704_s20 = smov %s1451_s23  ;;  %30 = sbr.rel (!%p28_p7) target bundleno = 20 (0x14), region = 106 }
 0x89e   :  { %946 = vsyncpa [#allocation5], 1 }
 0x89f   :  { %948 = vsyncpa [#allocation5 + $0x1], 1 }
 0x8a0   :  { %949 = vsyncpa [#allocation7], 1 }

</bundles_post_ra>
